<compile_context>
chip_gen: v7x
topology: tpu7x:2x2x1
jax: 0.10.0
libtpu: 0.0.40
codegen_flags: <defaults>
</compile_context>

<pallas_src>
import functools
import math

import jax
import jax.numpy as jnp
from jax.experimental import pallas as pl
from jax.experimental.pallas import tpu as pltpu

# ------------------------------- config (small, deterministic) ----------------------
BATCH = 2
SEQ = 8
HIDDEN = 32
NUM_HEADS = 4
HEAD_DIM = HIDDEN // NUM_HEADS


# ------------------------------------ kernel ----------------------------------------
def _self_attention_kernel(x_ref, wqkv_ref, bqkv_ref, o_ref, *,
                           batch, seq, num_heads, head_dim):
    """Single grid step: all batch elements at once; everything fits in VMEM."""
    hidden = num_heads * head_dim

    x = x_ref[...]                                               # (B*S, H) f32

    # One fused QKV projection on the MXU (M=B*S, N=3H). The attention scale
    # 1/sqrt(head_dim) is already folded into the Q columns by the wrapper.
    qkv = jnp.dot(x, wqkv_ref[...],
                  preferred_element_type=jnp.float32) + bqkv_ref[...]  # (B*S, 3H)

    # Regroup rows into (B, S, 3H): 16 -> (2, 8) splits sublanes exactly on the
    # native 8-row tile boundary, so this reshape is a layout no-op.
    qkv = qkv.reshape(batch, seq, 3 * hidden)

    ctx_heads = []
    for h in range(num_heads):                                   # static, 4 iters
        lo = h * head_dim
        q_h = qkv[:, :, lo:lo + head_dim]                              # (B, S, D)
        k_h = qkv[:, :, hidden + lo:hidden + lo + head_dim]            # (B, S, D)
        v_h = qkv[:, :, 2 * hidden + lo:2 * hidden + lo + head_dim]    # (B, S, D)

        # Batched over B in one einsum, contracting on d (no explicit transpose).
        s = jnp.einsum("bqd,bkd->bqk", q_h, k_h,
                       preferred_element_type=jnp.float32)             # (B, S, S)
        # Additive attention mask is all zeros in the source module -> skipped.
        m = jnp.max(s, axis=-1, keepdims=True)
        e = jnp.exp(s - m)
        denom = jnp.sum(e, axis=-1, keepdims=True)
        p = e * pl.reciprocal(denom, approx=True)                      # EUP vrcp
        # TODO(synk): attention-prob dropout (train mode) not implemented; eval identity.
        ctx_heads.append(jnp.einsum("bqk,bkd->bqd", p, v_h,
                                    preferred_element_type=jnp.float32))

    ctx = jnp.concatenate(ctx_heads, axis=-1)                    # (B, S, H)
    o_ref[...] = jnp.tanh(ctx)


# ------------------------------------ wrapper ---------------------------------------
def self_attention(x, wq, wk, wv, bq, bk, bv,
                   *, num_heads=NUM_HEADS, head_dim=HEAD_DIM):
    """x: (B, S, H) f32; w*: (H, H) s.t. proj = x @ w + b; b*: (H,)."""
    B, S, H = x.shape
    scale = 1.0 / math.sqrt(head_dim)

    # Fold the attention scale into the Q projection and fuse Q|K|V weights/biases
    # so the kernel issues a single (B*S, H) @ (H, 3H) matmul.
    wqkv = jnp.concatenate([wq * scale, wk, wv], axis=1)              # (H, 3H)
    bqkv = jnp.concatenate([bq * scale, bk, bv]).reshape(1, 3 * H)    # (1, 3H)
    x2d = x.reshape(B * S, H)

    kernel = functools.partial(_self_attention_kernel, batch=B, seq=S,
                               num_heads=num_heads, head_dim=head_dim)

    return pl.pallas_call(
        kernel,
        out_shape=jax.ShapeDtypeStruct((B, S, H), jnp.float32),
        grid_spec=pltpu.PrefetchScalarGridSpec(
            num_scalar_prefetch=0,
            grid=(1,),                                   # single grid point
            in_specs=[
                pl.BlockSpec((B * S, H), lambda i: (0, 0)),      # x (flattened)
                pl.BlockSpec((H, 3 * H), lambda i: (0, 0)),      # fused Wqkv
                pl.BlockSpec((1, 3 * H), lambda i: (0, 0)),      # fused bias
            ],
            out_specs=pl.BlockSpec((B, S, H), lambda i: (0, 0, 0)),
        ),
        compiler_params=pltpu.CompilerParams(
            dimension_semantics=("arbitrary",)),
    )(x2d, wqkv, bqkv)


# --------------------------- pure-JAX reference (for checking) ----------------------
def self_attention_ref(x, wq, wk, wv, bq, bk, bv,
                       *, num_heads=NUM_HEADS, head_dim=HEAD_DIM):
    B, S, H = x.shape
    q = x @ wq + bq
    k = x @ wk + bk
    v = x @ wv + bv

    def split(t):  # (B, S, H) -> (B, nh, S, hd)
        return t.reshape(B, S, num_heads, head_dim).transpose(0, 2, 1, 3)

    qh, kh, vh = split(q), split(k), split(v)
    scores = jnp.einsum("bhqd,bhkd->bhqk", qh, kh) / math.sqrt(head_dim)
    probs = jax.nn.softmax(scores, axis=-1)
    ctx = jnp.einsum("bhqk,bhkd->bhqd", probs, vh)
    ctx = ctx.transpose(0, 2, 1, 3).reshape(B, S, H)
    return jnp.tanh(ctx)


# -------------------------------------- main -----------------------------------------
if __name__ == "__main__":
    key = jax.random.PRNGKey(0)
    kx, kq, kk, kv, kbq, kbk, kbv = jax.random.split(key, 7)

    x = jax.random.normal(kx, (BATCH, SEQ, HIDDEN), dtype=jnp.float32)

    # Deterministic "Linear" parameters (shapes from BertSelfAttention.__init__:
    # three Linear(hidden, all_head_size) layers).
    std = 0.02
    wq = std * jax.random.normal(kq, (HIDDEN, HIDDEN), dtype=jnp.float32)
    wk = std * jax.random.normal(kk, (HIDDEN, HIDDEN), dtype=jnp.float32)
    wv = std * jax.random.normal(kv, (HIDDEN, HIDDEN), dtype=jnp.float32)
    bq = std * jax.random.normal(kbq, (HIDDEN,), dtype=jnp.float32)
    bk = std * jax.random.normal(kbk, (HIDDEN,), dtype=jnp.float32)
    bv = std * jax.random.normal(kbv, (HIDDEN,), dtype=jnp.float32)

    out = self_attention(x, wq, wk, wv, bq, bk, bv)
    out = jax.block_until_ready(out)

    ref = self_attention_ref(x, wq, wk, wv, bq, bk, bv)
    assert out.shape == (BATCH, SEQ, HIDDEN)
    # Tolerance slightly relaxed vs 1e-5 because the softmax denominator uses the
    # EUP approximate reciprocal (pl.reciprocal(approx=True)); tanh then
    # compresses the residual error further.
    assert jnp.allclose(out, ref, atol=1e-3, rtol=1e-3), "mismatch vs JAX reference"

    print("KERNEL_OK")
</pallas_src>

<mosaic_0001>
module attributes {stable_mosaic.version = 11 : i64} {
  func.func @_self_attention_kernel(%arg0: i32, %arg1: memref<16x32xf32, #tpu.memory_space<vmem>>, %arg2: memref<32x96xf32, #tpu.memory_space<vmem>>, %arg3: memref<1x96xf32, #tpu.memory_space<vmem>>, %arg4: memref<2x8x32xf32, #tpu.memory_space<vmem>>) attributes {dimension_semantics = [#tpu.dimension_semantics<arbitrary>], iteration_bounds = array<i64: 1>, scalar_prefetch = 0 : i64, scratch_operands = 0 : i64, tpu.core_type = #tpu.core_type<tc>, window_params = [{pipeline_mode = #tpu.pipeline_mode<synchronous>, transform_indices = @transform_0, window_bounds = array<i64: 16, 32>}, {pipeline_mode = #tpu.pipeline_mode<synchronous>, transform_indices = @transform_1, window_bounds = array<i64: 32, 96>}, {pipeline_mode = #tpu.pipeline_mode<synchronous>, transform_indices = @transform_2, window_bounds = array<i64: 1, 96>}, {pipeline_mode = #tpu.pipeline_mode<synchronous>, transform_indices = @transform_3, window_bounds = array<i64: 2, 8, 32>}]} {
    %c0 = arith.constant 0 : index
    %c0_0 = arith.constant 0 : index
    %0 = vector.load %arg1[%c0, %c0_0] : memref<16x32xf32, #tpu.memory_space<vmem>>, vector<16x32xf32>
    %c0_1 = arith.constant 0 : index
    %c0_2 = arith.constant 0 : index
    %1 = vector.load %arg2[%c0_1, %c0_2] : memref<32x96xf32, #tpu.memory_space<vmem>>, vector<32x96xf32>
    %cst = arith.constant dense<0.000000e+00> : vector<16x96xf32>
    %2 = tpu.matmul %0, %1, %cst {dimension_numbers = #tpu.dot_dimension_numbers<[1], [0], [0], [1], [0, 0, 1, 1], [], []>} : vector<16x32xf32>, vector<32x96xf32>, vector<16x96xf32> -> vector<16x96xf32>
    %c0_3 = arith.constant 0 : index
    %c0_4 = arith.constant 0 : index
    %3 = vector.load %arg3[%c0_3, %c0_4] : memref<1x96xf32, #tpu.memory_space<vmem>>, vector<1x96xf32>
    %4 = vector.broadcast %3 : vector<1x96xf32> to vector<16x96xf32>
    %5 = arith.addf %2, %4 : vector<16x96xf32>
    %6 = vector.shape_cast %5 : vector<16x96xf32> to vector<2x8x96xf32>
    %7 = vector.extract_strided_slice %6 {offsets = [0, 0, 0], sizes = [2, 8, 8], strides = [1, 1, 1]} : vector<2x8x96xf32> to vector<2x8x8xf32>
    %8 = vector.extract_strided_slice %6 {offsets = [0, 0, 32], sizes = [2, 8, 8], strides = [1, 1, 1]} : vector<2x8x96xf32> to vector<2x8x8xf32>
    %9 = vector.extract_strided_slice %6 {offsets = [0, 0, 64], sizes = [2, 8, 8], strides = [1, 1, 1]} : vector<2x8x96xf32> to vector<2x8x8xf32>
    "tpu.trace_start"() <{level = 10 : i32, message = "bqd,bkd->bqk"}> : () -> ()
    %cst_5 = arith.constant dense<0.000000e+00> : vector<2x8x8xf32>
    %10 = tpu.matmul %7, %8, %cst_5 {dimension_numbers = #tpu.dot_dimension_numbers<[2], [2], [1], [1], [0, 0, 0, 1, 1, 1], [0], [0]>} : vector<2x8x8xf32>, vector<2x8x8xf32>, vector<2x8x8xf32> -> vector<2x8x8xf32>
    "tpu.trace_stop"() : () -> ()
    %cst_6 = arith.constant dense<0xFF800000> : vector<2x8xf32>
    %11 = vector.multi_reduction <maximumf>, %10, %cst_6 [2] : vector<2x8x8xf32> to vector<2x8xf32>
    %12 = vector.shape_cast %11 : vector<2x8xf32> to vector<2x8x1xf32>
    %13 = vector.broadcast %12 : vector<2x8x1xf32> to vector<2x8x8xf32>
    %14 = arith.subf %10, %13 : vector<2x8x8xf32>
    %15 = math.exp %14 : vector<2x8x8xf32>
    %cst_7 = arith.constant dense<0.000000e+00> : vector<2x8xf32>
    %16 = vector.multi_reduction <add>, %15, %cst_7 [2] : vector<2x8x8xf32> to vector<2x8xf32>
    %17 = vector.shape_cast %16 : vector<2x8xf32> to vector<2x8x1xf32>
    %18 = tpu.reciprocal %17 {approx = true} : vector<2x8x1xf32> -> vector<2x8x1xf32>
    %19 = vector.broadcast %18 : vector<2x8x1xf32> to vector<2x8x8xf32>
    %20 = arith.mulf %15, %19 : vector<2x8x8xf32>
    "tpu.trace_start"() <{level = 10 : i32, message = "bqk,bkd->bqd"}> : () -> ()
    %cst_8 = arith.constant dense<0.000000e+00> : vector<2x8x8xf32>
    %21 = tpu.matmul %20, %9, %cst_8 {dimension_numbers = #tpu.dot_dimension_numbers<[2], [1], [1], [2], [0, 0, 0, 1, 1, 2], [0], [0]>} : vector<2x8x8xf32>, vector<2x8x8xf32>, vector<2x8x8xf32> -> vector<2x8x8xf32>
    "tpu.trace_stop"() : () -> ()
    %22 = vector.extract_strided_slice %6 {offsets = [0, 0, 8], sizes = [2, 8, 8], strides = [1, 1, 1]} : vector<2x8x96xf32> to vector<2x8x8xf32>
    %23 = vector.extract_strided_slice %6 {offsets = [0, 0, 40], sizes = [2, 8, 8], strides = [1, 1, 1]} : vector<2x8x96xf32> to vector<2x8x8xf32>
    %24 = vector.extract_strided_slice %6 {offsets = [0, 0, 72], sizes = [2, 8, 8], strides = [1, 1, 1]} : vector<2x8x96xf32> to vector<2x8x8xf32>
    "tpu.trace_start"() <{level = 10 : i32, message = "bqd,bkd->bqk"}> : () -> ()
    %cst_9 = arith.constant dense<0.000000e+00> : vector<2x8x8xf32>
    %25 = tpu.matmul %22, %23, %cst_9 {dimension_numbers = #tpu.dot_dimension_numbers<[2], [2], [1], [1], [0, 0, 0, 1, 1, 1], [0], [0]>} : vector<2x8x8xf32>, vector<2x8x8xf32>, vector<2x8x8xf32> -> vector<2x8x8xf32>
    "tpu.trace_stop"() : () -> ()
    %cst_10 = arith.constant dense<0xFF800000> : vector<2x8xf32>
    %26 = vector.multi_reduction <maximumf>, %25, %cst_10 [2] : vector<2x8x8xf32> to vector<2x8xf32>
    %27 = vector.shape_cast %26 : vector<2x8xf32> to vector<2x8x1xf32>
    %28 = vector.broadcast %27 : vector<2x8x1xf32> to vector<2x8x8xf32>
    %29 = arith.subf %25, %28 : vector<2x8x8xf32>
    %30 = math.exp %29 : vector<2x8x8xf32>
    %cst_11 = arith.constant dense<0.000000e+00> : vector<2x8xf32>
    %31 = vector.multi_reduction <add>, %30, %cst_11 [2] : vector<2x8x8xf32> to vector<2x8xf32>
    %32 = vector.shape_cast %31 : vector<2x8xf32> to vector<2x8x1xf32>
    %33 = tpu.reciprocal %32 {approx = true} : vector<2x8x1xf32> -> vector<2x8x1xf32>
    %34 = vector.broadcast %33 : vector<2x8x1xf32> to vector<2x8x8xf32>
    %35 = arith.mulf %30, %34 : vector<2x8x8xf32>
    "tpu.trace_start"() <{level = 10 : i32, message = "bqk,bkd->bqd"}> : () -> ()
    %cst_12 = arith.constant dense<0.000000e+00> : vector<2x8x8xf32>
    %36 = tpu.matmul %35, %24, %cst_12 {dimension_numbers = #tpu.dot_dimension_numbers<[2], [1], [1], [2], [0, 0, 0, 1, 1, 2], [0], [0]>} : vector<2x8x8xf32>, vector<2x8x8xf32>, vector<2x8x8xf32> -> vector<2x8x8xf32>
    "tpu.trace_stop"() : () -> ()
    %37 = vector.extract_strided_slice %6 {offsets = [0, 0, 16], sizes = [2, 8, 8], strides = [1, 1, 1]} : vector<2x8x96xf32> to vector<2x8x8xf32>
    %38 = vector.extract_strided_slice %6 {offsets = [0, 0, 48], sizes = [2, 8, 8], strides = [1, 1, 1]} : vector<2x8x96xf32> to vector<2x8x8xf32>
    %39 = vector.extract_strided_slice %6 {offsets = [0, 0, 80], sizes = [2, 8, 8], strides = [1, 1, 1]} : vector<2x8x96xf32> to vector<2x8x8xf32>
    "tpu.trace_start"() <{level = 10 : i32, message = "bqd,bkd->bqk"}> : () -> ()
    %cst_13 = arith.constant dense<0.000000e+00> : vector<2x8x8xf32>
    %40 = tpu.matmul %37, %38, %cst_13 {dimension_numbers = #tpu.dot_dimension_numbers<[2], [2], [1], [1], [0, 0, 0, 1, 1, 1], [0], [0]>} : vector<2x8x8xf32>, vector<2x8x8xf32>, vector<2x8x8xf32> -> vector<2x8x8xf32>
    "tpu.trace_stop"() : () -> ()
    %cst_14 = arith.constant dense<0xFF800000> : vector<2x8xf32>
    %41 = vector.multi_reduction <maximumf>, %40, %cst_14 [2] : vector<2x8x8xf32> to vector<2x8xf32>
    %42 = vector.shape_cast %41 : vector<2x8xf32> to vector<2x8x1xf32>
    %43 = vector.broadcast %42 : vector<2x8x1xf32> to vector<2x8x8xf32>
    %44 = arith.subf %40, %43 : vector<2x8x8xf32>
    %45 = math.exp %44 : vector<2x8x8xf32>
    %cst_15 = arith.constant dense<0.000000e+00> : vector<2x8xf32>
    %46 = vector.multi_reduction <add>, %45, %cst_15 [2] : vector<2x8x8xf32> to vector<2x8xf32>
    %47 = vector.shape_cast %46 : vector<2x8xf32> to vector<2x8x1xf32>
    %48 = tpu.reciprocal %47 {approx = true} : vector<2x8x1xf32> -> vector<2x8x1xf32>
    %49 = vector.broadcast %48 : vector<2x8x1xf32> to vector<2x8x8xf32>
    %50 = arith.mulf %45, %49 : vector<2x8x8xf32>
    "tpu.trace_start"() <{level = 10 : i32, message = "bqk,bkd->bqd"}> : () -> ()
    %cst_16 = arith.constant dense<0.000000e+00> : vector<2x8x8xf32>
    %51 = tpu.matmul %50, %39, %cst_16 {dimension_numbers = #tpu.dot_dimension_numbers<[2], [1], [1], [2], [0, 0, 0, 1, 1, 2], [0], [0]>} : vector<2x8x8xf32>, vector<2x8x8xf32>, vector<2x8x8xf32> -> vector<2x8x8xf32>
    "tpu.trace_stop"() : () -> ()
    %52 = vector.extract_strided_slice %6 {offsets = [0, 0, 24], sizes = [2, 8, 8], strides = [1, 1, 1]} : vector<2x8x96xf32> to vector<2x8x8xf32>
    %53 = vector.extract_strided_slice %6 {offsets = [0, 0, 56], sizes = [2, 8, 8], strides = [1, 1, 1]} : vector<2x8x96xf32> to vector<2x8x8xf32>
    %54 = vector.extract_strided_slice %6 {offsets = [0, 0, 88], sizes = [2, 8, 8], strides = [1, 1, 1]} : vector<2x8x96xf32> to vector<2x8x8xf32>
    "tpu.trace_start"() <{level = 10 : i32, message = "bqd,bkd->bqk"}> : () -> ()
    %cst_17 = arith.constant dense<0.000000e+00> : vector<2x8x8xf32>
    %55 = tpu.matmul %52, %53, %cst_17 {dimension_numbers = #tpu.dot_dimension_numbers<[2], [2], [1], [1], [0, 0, 0, 1, 1, 1], [0], [0]>} : vector<2x8x8xf32>, vector<2x8x8xf32>, vector<2x8x8xf32> -> vector<2x8x8xf32>
    "tpu.trace_stop"() : () -> ()
    %cst_18 = arith.constant dense<0xFF800000> : vector<2x8xf32>
    %56 = vector.multi_reduction <maximumf>, %55, %cst_18 [2] : vector<2x8x8xf32> to vector<2x8xf32>
    %57 = vector.shape_cast %56 : vector<2x8xf32> to vector<2x8x1xf32>
    %58 = vector.broadcast %57 : vector<2x8x1xf32> to vector<2x8x8xf32>
    %59 = arith.subf %55, %58 : vector<2x8x8xf32>
    %60 = math.exp %59 : vector<2x8x8xf32>
    %cst_19 = arith.constant dense<0.000000e+00> : vector<2x8xf32>
    %61 = vector.multi_reduction <add>, %60, %cst_19 [2] : vector<2x8x8xf32> to vector<2x8xf32>
    %62 = vector.shape_cast %61 : vector<2x8xf32> to vector<2x8x1xf32>
    %63 = tpu.reciprocal %62 {approx = true} : vector<2x8x1xf32> -> vector<2x8x1xf32>
    %64 = vector.broadcast %63 : vector<2x8x1xf32> to vector<2x8x8xf32>
    %65 = arith.mulf %60, %64 : vector<2x8x8xf32>
    "tpu.trace_start"() <{level = 10 : i32, message = "bqk,bkd->bqd"}> : () -> ()
    %cst_20 = arith.constant dense<0.000000e+00> : vector<2x8x8xf32>
    %66 = tpu.matmul %65, %54, %cst_20 {dimension_numbers = #tpu.dot_dimension_numbers<[2], [1], [1], [2], [0, 0, 0, 1, 1, 2], [0], [0]>} : vector<2x8x8xf32>, vector<2x8x8xf32>, vector<2x8x8xf32> -> vector<2x8x8xf32>
    "tpu.trace_stop"() : () -> ()
    %67 = tpu.concatenate %21, %36, %51, %66 in 2 : vector<2x8x8xf32>, vector<2x8x8xf32>, vector<2x8x8xf32>, vector<2x8x8xf32> -> vector<2x8x32xf32>
    %68 = math.tanh %67 : vector<2x8x32xf32>
    %c0_21 = arith.constant 0 : index
    %c0_22 = arith.constant 0 : index
    %c0_23 = arith.constant 0 : index
    %69 = vector.load %arg4[%c0_21, %c0_22, %c0_23] : memref<2x8x32xf32, #tpu.memory_space<vmem>>, vector<2x8x32xf32>
    tpu.vector_store %arg4[%c0_21, %c0_22, %c0_23], %68 {strides = array<i32>} : memref<2x8x32xf32, #tpu.memory_space<vmem>>, vector<2x8x32xf32>,
    return
  }
  func.func @transform_0(%arg0: i32) -> (i32, i32) {
    %c0_i32 = arith.constant 0 : i32
    %c0_i32_0 = arith.constant 0 : i32
    %c0_i32_1 = arith.constant 0 : i32
    return %c0_i32, %c0_i32_0 : i32, i32
  }
  func.func @transform_1(%arg0: i32) -> (i32, i32) {
    %c0_i32 = arith.constant 0 : i32
    %c0_i32_0 = arith.constant 0 : i32
    %c0_i32_1 = arith.constant 0 : i32
    return %c0_i32, %c0_i32_0 : i32, i32
  }
  func.func @transform_2(%arg0: i32) -> (i32, i32) {
    %c0_i32 = arith.constant 0 : i32
    %c0_i32_0 = arith.constant 0 : i32
    %c0_i32_1 = arith.constant 0 : i32
    return %c0_i32, %c0_i32_0 : i32, i32
  }
  func.func @transform_3(%arg0: i32) -> (i32, i32, i32) {
    %c0_i32 = arith.constant 0 : i32
    %c0_i32_0 = arith.constant 0 : i32
    %c0_i32_1 = arith.constant 0 : i32
    %c0_i32_2 = arith.constant 0 : i32
    return %c0_i32, %c0_i32_0, %c0_i32_1 : i32, i32, i32
  }
}

</mosaic_0001>

<bundles_post_ra>
// kernel: tpu_custom_call.1
= control target key start
LH: loop header
LB: loop body
LE: loop exit
PB: predicated region body
PF: predicated region fallthrough
CT: control target
= control target key end

     0   :  { %8 = vsyncpa [#allocation3], 0  ;;  %s2027_s0 = inlined_call_operand.hbm [shape: f32[16,32], index: 0, kind: input, shape index: {}]   ;;  %s2028_s1 = inlined_call_operand.hbm [shape: f32[32,96], index: 1, kind: input, shape index: {}]   ;;  %s2029_s2 = inlined_call_operand.vmem [shape: f32[1,96], index: 2, kind: input, shape index: {}]   ;;  %s2030_s3 = inlined_call_operand.hbm [shape: f32[2,8,32], index: 3, kind: output, shape index: {}]  }
   0x1   :  { %9 = vsyncpa [#allocation6], 0 }
   0x2   :  { %10 = vsyncpa [#allocation4], 0  ;;  %s1803_s12 = smov [#allocation2]   ;;  %s1731_s16 = scalar_lea.hbm %s2027_s0, 256 }
   0x3   :  { %s16_s13 = sshll.u32 %s1803_s12, 4  ;;  %p1732_p0 = scmp.ne.s32.totalorder %s2027_s0, %s1731_s16  ;;  %s17_s13 = int_to_ptr.vmem [resolvable:$true] %s16_s13 }
   0x4   :  { %p1735_p1 = scmp.lt.u32.totalorder %s1731_s16, %s2027_s0 }
   0x6   :  { %p1737_p2 = pnand %p1735_p1, %p1732_p0 }
   0x8   :  { %1740 = shalt.err (!%p1737_p2)
}
   0x9   :  { %s1741_s21 = scalar_lea.vmem %s17_s13, 256  ;;  %p1746_p4 = scmp.lt.s32.totalorder %s17_s13, %s17_s13 }
   0xa   :  { %p1742_p3 = scmp.ne.s32.totalorder %s17_s13, %s1741_s21  ;;  %p1747_p5 = scmp.lt.s32.totalorder %s1741_s21, %s1741_s21 }
   0xc   :  { %p1748_p6 = por %p1747_p5, %p1746_p4 }
   0xe   :  { %p1749_p7 = pnand %p1748_p6, %p1742_p3 }
  0x10   :  { %1752 = shalt.err (!%p1749_p7)
}
  0x11   :  { %s1804_s22 = smov 128   ;;  %s1805_s23 = smov 8  }
  0x12   :  { %22 = dma.hbm_to_vmem [thread:$0]  %s2027_s0, 256, %s17_s13, [#allocation3], %s1804_s22, %s1804_s22, %s1805_s23  }
  0x13   :  { %s1806_s26 = smov [#allocation5]   ;;  %s1753_s30 = scalar_lea.hbm %s2028_s1, 512 }
  0x14   :  { %s28_s27 = sshll.u32 %s1806_s26, 4  ;;  %p1754_p8 = scmp.ne.s32.totalorder %s2028_s1, %s1753_s30  ;;  %s29_s27 = int_to_ptr.vmem [resolvable:$true] %s28_s27 }
  0x15   :  { %p1757_p9 = scmp.lt.u32.totalorder %s1753_s30, %s2028_s1 }
  0x17   :  { %p1759_p10 = pnand %p1757_p9, %p1754_p8 }
  0x19   :  { %1762 = shalt.err (!%p1759_p10)
}
  0x1a   :  { %s1763_s8 = scalar_lea.vmem %s29_s27, 512  ;;  %p1768_p12 = scmp.lt.s32.totalorder %s29_s27, %s29_s27 }
  0x1b   :  { %p1764_p11 = scmp.ne.s32.totalorder %s29_s27, %s1763_s8  ;;  %p1769_p13 = scmp.lt.s32.totalorder %s1763_s8, %s1763_s8 }
  0x1d   :  { %p1770_p0 = por %p1769_p13, %p1768_p12 }
  0x1f   :  { %p1771_p1 = pnand %p1770_p0, %p1764_p11 }
  0x21   :  { %1774 = shalt.err (!%p1771_p1)
}
  0x22   :  { %34 = dma.hbm_to_vmem [thread:$0]  %s2028_s1, 512, %s29_s27, [#allocation6], %s1804_s22, %s1804_s22, %s1805_s23  }
  0x23   :  { %1797 = dma.done.wait [#allocation3], 256  }
  0x24   :  { %1798 = vsyncadd [#allocation3], 4294967040 }
  0x25   :  { %1799 = dma.done.wait [#allocation6], 512  }
  0x26   :  { %1800 = vsyncadd [#allocation6], 4294966784  ;;  %vm56_vm0 = vcmask 261120   ;;  %v45_v0 = vld [vmem:[#allocation5] sm:$0xff]  ;;  %v46_v1 = vld [vmem:[#allocation5 + $0x8] sm:$0xff]  ;;  %v1807_v8 = vmov 0.0  }
  0x27   :  { %v47_v2 = vld [vmem:[#allocation5 + $0x10] sm:$0xff]  ;;  %v1667_v3 = vpack.c.bf16 %v46_v1, %v45_v0  ;;  %v48_v4 = vld [vmem:[#allocation5 + $0x18] sm:$0xff]  ;;  %1587 = vmatprep.subr.mxu1 %v1807_v8  ;;  %vm1808_vm1 = vmmov 0   ;;  %s1809_s11 = smov 96   ;;  %vm141_vm2 = vcmask 64512   ;;  %s1811_s12 = smov 88  }
  0x28   :  { %v43_v5 = vld [vmem:[#allocation2] sm:$0xff]  ;;  %v1671_v6 = vpack.c.bf16 %v48_v4, %v47_v2  ;;  %v44_v7 = vld [vmem:[#allocation2 + $0x8] sm:$0xff]  ;;  %1589 = vmatprep.mubr.msk.f32.mxu1 %vm1808_vm1, %v1807_v8  ;;  %s1812_s13 = smov 120   ;;  %s1813_s14 = smov 56   ;;  %vm1486_vm3 = vcmask 195584   ;;  %vm1483_vm4 = vcmask 130048  }
  0x29   :  { %1584 = vmatprep.mubr.msk.f32.mxu0 %vm56_vm0, %v43_v5  ;;  %1668 = vmatprep.subr.bf16.mxu0 %v1667_v3  ;;  %v1511_v9 = vld [vmem:[%s2029_s2] ss:$0 sm:$0xff]  ;;  %s1810_s2 = smov 64   ;;  %s1814_s15 = smov 80  }
  0x2a   :  { %1670 = vmatpush3.bf16.msra.mxu0 %v1667_v3  ;;  %s1815_s16 = smov 112   ;;  %s1816_s17 = smov 48  }
  0x2b   :  { %1672 = vmatprep.subr.bf16.mxu0 %v1671_v6  ;;  %s1817_s18 = smov 72   ;;  %s1818_s19 = smov 104  }
  0x2c   :  { %s1819_s20 = smov 40   ;;  %s1820_s21 = smov 16  }
  0x2d   :  { %s1821_s24 = smov 24   ;;  %s1822_s25 = smov [#allocation7]  }
  0x2e   :  { %1674 = vmatpush3.bf16.msra.mxu0 %v1671_v6  ;;  %s1498_s26 = sshll.u32 %s1822_s25, 4  ;;  %s1499_s26 = int_to_ptr.vmem [resolvable:$true] %s1498_s26 }
  0x2f   :  { %1597 = vmatprep.subr.mxu0 %v1807_v8  ;;  %s1775_s27 = scalar_lea.vmem %s1499_s26, 256  ;;  %p1780_p3 = scmp.lt.s32.totalorder %s1499_s26, %s1499_s26 }
  0x30   :  { %p1776_p2 = scmp.ne.s32.totalorder %s1499_s26, %s1775_s27  ;;  %p1781_p4 = scmp.lt.s32.totalorder %s1775_s27, %s1775_s27 }
  0x31   :  { %1585 = vmatmul.mubr.msk.f32.vlgmr.msra.gmra.mrb[0].mxu0 %vm56_vm0, %v44_v7 }
  0x32   :  { %1599 = vmatprep.mubr.msk.f32.mxu0 %vm1808_vm1, %v1807_v8  ;;  %p1782_p5 = por %p1781_p4, %p1780_p3 }
  0x34   :  { %p1783_p6 = pnand %p1782_p5, %p1776_p2 }
 0x104   :  { %v1586_v10 = vpop.f32.mrb[0].mxu0 }
 0x105   :  { %v129_v11 = vpop.f32.mrb[1].mxu0  ;;  %v1887_v13 = vadd.f32 %v1586_v10, %v1511_v9 }
 0x106   :  { %v1884_v12 = vadd.f32 %v1511_v9, %v129_v11 }
 0x108   :  { %139 = vrot.lane.b32.xlu0 %v1884_v12, %s1809_s11 }
 0x10c   :  { %217 = vrot.lane.b32.xlu0 %v1887_v13, %s1809_s11 }
 0x17a   :  { %v140_v14 = vpop.permute.xlu0 %139 }
 0x17b   :  { %1588 = vmatpush3.xpose.msk.msra.mxu1 %vm141_vm2, %v140_v14 }
 0x17c   :  { %1592 = vmatprep.subr.mxu1 %v1807_v8 }
 0x17e   :  { %1590 = vmatmul.mubr.msk.f32.vlgmr.msra.gmra.mrb[0].mxu1 %vm141_vm2, %v1884_v12  ;;  %v218_v15 = vpop.permute.xlu0 %217 }
 0x17f   :  { %1593 = vmatpush3.xpose.msk.msra.mxu1 %vm141_vm2, %v218_v15  ;;  %1594 = vmatprep.mubr.msk.f32.mxu1 %vm1808_vm1, %v1807_v8 }
 0x180   :  { %1602 = vmatprep.subr.mxu1 %v1807_v8 }
 0x182   :  { %1595 = vmatmul.mubr.msk.f32.vlgmr.msra.gmra.mrb[2].mxu1 %vm141_vm2, %v1887_v13 }
 0x183   :  { %1604 = vmatprep.mubr.msk.f32.mxu1 %vm1808_vm1, %v1807_v8 }
 0x251   :  { %v212_v16 = vpop.f32.mrb[0].mxu1 }
 0x252   :  { %v1591_v17 = vpop.f32.mrb[1].mxu1  ;;  %v293_v18 = vsel %vm141_vm2, %v212_v16, -inf }
 0x253   :  { %294 = vmax.xlane.f32.xlu1 %v293_v18 }
 0x255   :  { %v289_v19 = vpop.f32.mrb[2].mxu1 }
 0x256   :  { %v1596_v20 = vpop.f32.mrb[3].mxu1  ;;  %v296_v21 = vsel %vm141_vm2, %v289_v19, -inf }
 0x257   :  { %297 = vmax.xlane.f32.xlu1 %v296_v21 }
 0x268   :  { %315 = vrot.lane.b32.xlu1 %v1884_v12, %s1810_s2 }
 0x26c   :  { %391 = vrot.lane.b32.xlu1 %v1887_v13, %s1810_s2 }
 0x270   :  { %469 = vrot.lane.b32.xlu1 %v1884_v12, %s1811_s12 }
 0x274   :  { %547 = vrot.lane.b32.xlu1 %v1887_v13, %s1811_s12 }
 0x2e0   :  { %v295_v22 = vpop.xlane.xlu1 %294 }
 0x2e1   :  { %v299_v23 = vsub.f32 %v212_v16, %v295_v22 }
 0x2e3   :  { %v301_v24 = vmul.f32 1.442695, %v299_v23 }
 0x2e4   :  { %v298_v25 = vpop.xlane.xlu1 %297 }
 0x2e5   :  { %1695 = vpow2.f32 %v301_v24  ;;  %v300_v26 = vsub.f32 %v289_v19, %v298_v25 }
 0x2e7   :  { %v303_v27 = vmul.f32 1.442695, %v300_v26 }
 0x2e8   :  { %v316_v28 = vpop.permute.xlu1 %315 }
 0x2e9   :  { %1697 = vpow2.f32 %v303_v27  ;;  %1598 = vmatpush3.msra.mxu0 %v316_v28 }
 0x2ea   :  { %1607 = vmatprep.subr.mxu0 %v1807_v8 }
 0x2ec   :  { %v392_v29 = vpop.permute.xlu1 %391 }
 0x2ed   :  { %1603 = vmatpush3.msra.mxu1 %v392_v29 }
 0x2ee   :  { %1612 = vmatprep.subr.mxu1 %v1807_v8 }
 0x2ef   :  { %v1696_v30 = vpop.eup %1695 }
 0x2f0   :  { %v305_v31 = vsel %vm141_vm2, %v1696_v30, 0.0  ;;  %v470_v34 = vpop.permute.xlu1 %469 }
 0x2f1   :  { %306 = vadd.xlane.f32.xlu0 %v305_v31 }
 0x2f3   :  { %v1698_v32 = vpop.eup %1697 }
 0x2f4   :  { %v308_v33 = vsel %vm141_vm2, %v1698_v32, 0.0  ;;  %v548_v35 = vpop.permute.xlu1 %547 }
 0x2f5   :  { %309 = vadd.xlane.f32.xlu1 %v308_v33 }
 0x306   :  { %545 = vrot.lane.b32.xlu1 %v1887_v13, %s1812_s13 }
 0x307   :  { %467 = vrot.lane.b32.xlu0 %v1884_v12, %s1812_s13 }
 0x37e   :  { %v307_v36 = vpop.xlane.xlu0 %306 }
 0x37f   :  { %1699 = vrcp.f32 %v307_v36 }
 0x382   :  { %v310_v37 = vpop.xlane.xlu1 %309  ;;  %v468_v42 = vpop.permute.xlu0 %467 }
 0x383   :  { %1701 = vrcp.f32 %v310_v37 }
 0x386   :  { %v546_v43 = vpop.permute.xlu1 %545 }
 0x389   :  { %v1700_v38 = vpop.eup %1699 }
 0x38a   :  { %v313_v39 = vmul.f32 %v1700_v38, %v1696_v30 }
 0x38c   :  { %1600 = vmatmul.mubr.msk.f32.vlgmr.msra.gmra.mrb[2].mxu0 %vm141_vm2, %v313_v39 }
 0x38d   :  { %v1702_v40 = vpop.eup %1701  ;;  %1608 = vmatpush3.xpose.msk.msra.mxu0 %vm141_vm2, %v470_v34  ;;  %1609 = vmatprep.mubr.msk.f32.mxu0 %vm1808_vm1, %v1807_v8 }
 0x38e   :  { %v314_v41 = vmul.f32 %v1702_v40, %v1698_v32  ;;  %1617 = vmatprep.subr.mxu0 %v1807_v8 }
 0x390   :  { %1605 = vmatmul.mubr.msk.f32.vlgmr.msra.gmra.mrb[4].mxu1 %vm141_vm2, %v314_v41  ;;  %1610 = vmatmul.mubr.msk.f32.vlgmr.msra.gmra.mrb[4].mxu0 %vm141_vm2, %v468_v42 }
 0x391   :  { %1613 = vmatpush3.xpose.msk.msra.mxu1 %vm141_vm2, %v548_v35  ;;  %1614 = vmatprep.mubr.msk.f32.mxu1 %vm1808_vm1, %v1807_v8 }
 0x392   :  { %1622 = vmatprep.subr.mxu1 %v1807_v8  ;;  %1619 = vmatprep.mubr.msk.f32.mxu0 %vm1808_vm1, %v1807_v8 }
 0x394   :  { %1615 = vmatmul.mubr.msk.f32.vlgmr.msra.gmra.mrb[6].mxu1 %vm141_vm2, %v546_v43 }
 0x395   :  { %1624 = vmatprep.mubr.msk.f32.mxu1 %vm1808_vm1, %v1807_v8 }
 0x45f   :  { %v1930_v44 = vpop.f32.mrb[2].mxu0 }
 0x460   :  { %v1601_v45 = vpop.f32.mrb[3].mxu0 }
 0x463   :  { %v1932_v46 = vpop.f32.mrb[4].mxu1  ;;  %v541_v47 = vpop.f32.mrb[4].mxu0 }
 0x464   :  { %v1606_v48 = vpop.f32.mrb[5].mxu1  ;;  %v1611_v49 = vpop.f32.mrb[5].mxu0  ;;  %v623_v50 = vsel %vm141_vm2, %v541_v47, -inf }
 0x465   :  { %624 = vmax.xlane.f32.xlu1 %v623_v50 }
 0x467   :  { %v619_v51 = vpop.f32.mrb[6].mxu1 }
 0x468   :  { %v1616_v52 = vpop.f32.mrb[7].mxu1  ;;  %v626_v53 = vsel %vm141_vm2, %v619_v51, -inf }
 0x469   :  { %627 = vmax.xlane.f32.xlu0 %v626_v53 }
 0x476   :  { %645 = vrot.lane.b32.xlu1 %v1884_v12, %s1813_s14 }
 0x47a   :  { %799 = vrot.lane.b32.xlu1 %v1884_v12, %s1814_s15 }
 0x47e   :  { %877 = vrot.lane.b32.xlu1 %v1887_v13, %s1814_s15 }
 0x47f   :  { %721 = vrot.lane.b32.xlu0 %v1887_v13, %s1813_s14 }
 0x483   :  { %797 = vrot.lane.b32.xlu0 %v1884_v12, %s1815_s16 }
 0x4f2   :  { %v625_v54 = vpop.xlane.xlu1 %624 }
 0x4f3   :  { %v629_v55 = vsub.f32 %v541_v47, %v625_v54 }
 0x4f5   :  { %v631_v56 = vmul.f32 1.442695, %v629_v55 }
 0x4f6   :  { %v646_v57 = vpop.permute.xlu1 %645  ;;  %v628_v58 = vpop.xlane.xlu0 %627 }
 0x4f7   :  { %1703 = vpow2.f32 %v631_v56  ;;  %v630_v59 = vsub.f32 %v619_v51, %v628_v58  ;;  %1618 = vmatpush3.msra.mxu0 %v646_v57 }
 0x4f8   :  { %1627 = vmatprep.subr.mxu0 %v1807_v8 }
 0x4f9   :  { %v633_v60 = vmul.f32 1.442695, %v630_v59 }
 0x4fa   :  { %v722_v61 = vpop.permute.xlu0 %721  ;;  %v800_v2 = vpop.permute.xlu1 %799 }
 0x4fb   :  { %1705 = vpow2.f32 %v633_v60  ;;  %1623 = vmatpush3.msra.mxu1 %v722_v61 }
 0x4fc   :  { %1632 = vmatprep.subr.mxu1 %v1807_v8 }
 0x4fe   :  { %v878_v3 = vpop.permute.xlu1 %877  ;;  %v798_v11 = vpop.permute.xlu0 %797 }
 0x501   :  { %v1704_v62 = vpop.eup %1703 }
 0x502   :  { %v635_v63 = vsel %vm141_vm2, %v1704_v62, 0.0 }
 0x503   :  { %636 = vadd.xlane.f32.xlu1 %v635_v63 }
 0x505   :  { %v1706_v0 = vpop.eup %1705 }
 0x506   :  { %v638_v1 = vsel %vm141_vm2, %v1706_v0, 0.0 }
 0x507   :  { %639 = vadd.xlane.f32.xlu1 %v638_v1 }
 0x518   :  { %875 = vrot.lane.b32.xlu1 %v1887_v13, %s1815_s16 }
 0x590   :  { %v637_v4 = vpop.xlane.xlu1 %636 }
 0x591   :  { %1707 = vrcp.f32 %v637_v4 }
 0x594   :  { %v640_v5 = vpop.xlane.xlu1 %639 }
 0x595   :  { %1709 = vrcp.f32 %v640_v5 }
 0x598   :  { %v876_v14 = vpop.permute.xlu1 %875 }
 0x59b   :  { %v1708_v6 = vpop.eup %1707 }
 0x59c   :  { %v643_v7 = vmul.f32 %v1708_v6, %v1704_v62 }
 0x59e   :  { %1620 = vmatmul.mubr.msk.f32.vlgmr.msra.gmra.mrb[6].mxu0 %vm141_vm2, %v643_v7 }
 0x59f   :  { %v1710_v9 = vpop.eup %1709  ;;  %1628 = vmatpush3.xpose.msk.msra.mxu0 %vm141_vm2, %v800_v2  ;;  %1629 = vmatprep.mubr.msk.f32.mxu0 %vm1808_vm1, %v1807_v8 }
 0x5a0   :  { %v644_v10 = vmul.f32 %v1710_v9, %v1706_v0  ;;  %1637 = vmatprep.subr.mxu0 %v1807_v8 }
 0x5a2   :  { %1625 = vmatmul.mubr.msk.f32.vlgmr.msra.gmra.mrb[8].mxu1 %vm141_vm2, %v644_v10  ;;  %1630 = vmatmul.mubr.msk.f32.vlgmr.msra.gmra.mrb[8].mxu0 %vm141_vm2, %v798_v11 }
 0x5a3   :  { %1633 = vmatpush3.xpose.msk.msra.mxu1 %vm141_vm2, %v878_v3  ;;  %1634 = vmatprep.mubr.msk.f32.mxu1 %vm1808_vm1, %v1807_v8 }
 0x5a4   :  { %1642 = vmatprep.subr.mxu1 %v1807_v8  ;;  %1639 = vmatprep.mubr.msk.f32.mxu0 %vm1808_vm1, %v1807_v8 }
 0x5a6   :  { %1635 = vmatmul.mubr.msk.f32.vlgmr.msra.gmra.mrb[10].mxu1 %vm141_vm2, %v876_v14 }
 0x5a7   :  { %1644 = vmatprep.mubr.msk.f32.mxu1 %vm1808_vm1, %v1807_v8 }
 0x671   :  { %v1962_v15 = vpop.f32.mrb[6].mxu0 }
 0x672   :  { %v1621_v16 = vpop.f32.mrb[7].mxu0 }
 0x675   :  { %v1964_v17 = vpop.f32.mrb[8].mxu1  ;;  %v871_v18 = vpop.f32.mrb[8].mxu0 }
 0x676   :  { %v1626_v19 = vpop.f32.mrb[9].mxu1  ;;  %v1631_v20 = vpop.f32.mrb[9].mxu0  ;;  %v953_v21 = vsel %vm141_vm2, %v871_v18, -inf }
 0x677   :  { %954 = vmax.xlane.f32.xlu0 %v953_v21 }
 0x679   :  { %v949_v22 = vpop.f32.mrb[10].mxu1 }
 0x67a   :  { %v1636_v23 = vpop.f32.mrb[11].mxu1  ;;  %v956_v24 = vsel %vm141_vm2, %v949_v22, -inf }
 0x67b   :  { %957 = vmax.xlane.f32.xlu1 %v956_v24 }
 0x68c   :  { %975 = vrot.lane.b32.xlu1 %v1884_v12, %s1816_s17 }
 0x68d   :  { %1051 = vrot.lane.b32.xlu0 %v1887_v13, %s1816_s17 }
 0x690   :  { %1129 = vrot.lane.b32.xlu1 %v1884_v12, %s1817_s18 }
 0x694   :  { %1207 = vrot.lane.b32.xlu1 %v1887_v13, %s1817_s18 }
 0x698   :  { %1205 = vrot.lane.b32.xlu1 %v1887_v13, %s1818_s19 }
 0x704   :  { %v955_v25 = vpop.xlane.xlu0 %954 }
 0x705   :  { %v959_v26 = vsub.f32 %v871_v18, %v955_v25 }
 0x707   :  { %v961_v27 = vmul.f32 1.442695, %v959_v26 }
 0x708   :  { %v958_v28 = vpop.xlane.xlu1 %957  ;;  %v1052_v29 = vpop.permute.xlu0 %1051 }
 0x709   :  { %1711 = vpow2.f32 %v961_v27  ;;  %v960_v30 = vsub.f32 %v949_v22, %v958_v28  ;;  %1643 = vmatpush3.msra.mxu1 %v1052_v29 }
 0x70a   :  { %1652 = vmatprep.subr.mxu1 %v1807_v8 }
 0x70b   :  { %v963_v31 = vmul.f32 1.442695, %v960_v30 }
 0x70c   :  { %v976_v32 = vpop.permute.xlu1 %975 }
 0x70d   :  { %1713 = vpow2.f32 %v963_v31  ;;  %1638 = vmatpush3.msra.mxu0 %v976_v32 }
 0x70e   :  { %1647 = vmatprep.subr.mxu0 %v1807_v8 }
 0x710   :  { %v1130_v39 = vpop.permute.xlu1 %1129 }
 0x713   :  { %v1712_v33 = vpop.eup %1711 }
 0x714   :  { %v965_v34 = vsel %vm141_vm2, %v1712_v33, 0.0  ;;  %v1208_v43 = vpop.permute.xlu1 %1207 }
 0x715   :  { %966 = vadd.xlane.f32.xlu0 %v965_v34 }
 0x717   :  { %v1714_v35 = vpop.eup %1713 }
 0x718   :  { %v968_v36 = vsel %vm141_vm2, %v1714_v35, 0.0  ;;  %v1206_v48 = vpop.permute.xlu1 %1205 }
 0x719   :  { %969 = vadd.xlane.f32.xlu0 %v968_v36 }
 0x72f   :  { %1127 = vrot.lane.b32.xlu0 %v1884_v12, %s1818_s19 }
 0x7a2   :  { %v967_v37 = vpop.xlane.xlu0 %966 }
 0x7a3   :  { %1715 = vrcp.f32 %v967_v37 }
 0x7a6   :  { %v970_v38 = vpop.xlane.xlu0 %969 }
 0x7a7   :  { %1717 = vrcp.f32 %v970_v38 }
 0x7aa   :  { %v1128_v47 = vpop.permute.xlu0 %1127 }
 0x7ad   :  { %v1716_v40 = vpop.eup %1715 }
 0x7ae   :  { %v973_v41 = vmul.f32 %v1716_v40, %v1712_v33 }
 0x7b0   :  { %1640 = vmatmul.mubr.msk.f32.vlgmr.msra.gmra.mrb[10].mxu0 %vm141_vm2, %v973_v41 }
 0x7b1   :  { %v1718_v42 = vpop.eup %1717  ;;  %1648 = vmatpush3.xpose.msk.msra.mxu0 %vm141_vm2, %v1130_v39  ;;  %1649 = vmatprep.mubr.msk.f32.mxu0 %vm1808_vm1, %v1807_v8 }
 0x7b2   :  { %v974_v45 = vmul.f32 %v1718_v42, %v1714_v35  ;;  %1657 = vmatprep.subr.mxu0 %v1807_v8 }
 0x7b4   :  { %1645 = vmatmul.mubr.msk.f32.vlgmr.msra.gmra.mrb[12].mxu1 %vm141_vm2, %v974_v45  ;;  %1650 = vmatmul.mubr.msk.f32.vlgmr.msra.gmra.mrb[12].mxu0 %vm141_vm2, %v1128_v47 }
 0x7b5   :  { %1653 = vmatpush3.xpose.msk.msra.mxu1 %vm141_vm2, %v1208_v43  ;;  %1654 = vmatprep.mubr.msk.f32.mxu1 %vm1808_vm1, %v1807_v8 }
 0x7b6   :  { %1662 = vmatprep.subr.mxu1 %v1807_v8  ;;  %1659 = vmatprep.mubr.msk.f32.mxu0 %vm1808_vm1, %v1807_v8 }
 0x7b8   :  { %1655 = vmatmul.mubr.msk.f32.vlgmr.msra.gmra.mrb[14].mxu1 %vm141_vm2, %v1206_v48 }
 0x7b9   :  { %1664 = vmatprep.mubr.msk.f32.mxu1 %vm1808_vm1, %v1807_v8 }
 0x883   :  { %v1047_v49 = vpop.f32.mrb[10].mxu0 }
 0x884   :  { %v1641_v50 = vpop.f32.mrb[11].mxu0 }
 0x887   :  { %v1123_v51 = vpop.f32.mrb[12].mxu1  ;;  %v1201_v52 = vpop.f32.mrb[12].mxu0 }
 0x888   :  { %v1646_v53 = vpop.f32.mrb[13].mxu1  ;;  %v1651_v54 = vpop.f32.mrb[13].mxu0  ;;  %v1283_v55 = vsel %vm141_vm2, %v1201_v52, -inf }
 0x889   :  { %1284 = vmax.xlane.f32.xlu0 %v1283_v55 }
 0x88b   :  { %v1279_v56 = vpop.f32.mrb[14].mxu1 }
 0x88c   :  { %v1656_v57 = vpop.f32.mrb[15].mxu1  ;;  %v1286_v58 = vsel %vm141_vm2, %v1279_v56, -inf }
 0x88d   :  { %1287 = vmax.xlane.f32.xlu1 %v1286_v58 }
 0x89e   :  { %1305 = vrot.lane.b32.xlu1 %v1884_v12, %s1819_s20 }
 0x8a2   :  { %1459 = vrot.lane.b32.xlu1 %v1962_v15, %s1805_s23 }
 0x8a6   :  { %1461 = vrot.lane.b32.xlu1 %v1964_v17, %s1805_s23 }
 0x8aa   :  { %1469 = vrot.lane.b32.xlu1 %v1123_v51, %s1820_s21 }
 0x916   :  { %v1285_v8 = vpop.xlane.xlu0 %1284 }
 0x917   :  { %v1289_v59 = vsub.f32 %v1201_v52, %v1285_v8 }
 0x919   :  { %v1291_v60 = vmul.f32 1.442695, %v1289_v59 }
 0x91a   :  { %v1288_v61 = vpop.xlane.xlu1 %1287 }
 0x91b   :  { %1719 = vpow2.f32 %v1291_v60  ;;  %v1290_v62 = vsub.f32 %v1279_v56, %v1288_v61 }
 0x91d   :  { %v1293_v63 = vmul.f32 1.442695, %v1290_v62 }
 0x91e   :  { %v1306_v0 = vpop.permute.xlu1 %1305 }
 0x91f   :  { %1721 = vpow2.f32 %v1293_v63  ;;  %1658 = vmatpush3.msra.mxu0 %v1306_v0 }
 0x922   :  { %v1460_v17 = vpop.permute.xlu1 %1459 }
 0x923   :  { %v1481_v20 = vsel %vm141_vm2, %v1930_v44, %v1460_v17 }
 0x925   :  { %v1720_v1 = vpop.eup %1719 }
 0x926   :  { %v1295_v12 = vsel %vm141_vm2, %v1720_v1, 0.0  ;;  %v1462_v18 = vpop.permute.xlu1 %1461 }
 0x927   :  { %1296 = vadd.xlane.f32.xlu0 %v1295_v12  ;;  %v1482_v25 = vsel %vm141_vm2, %v1932_v46, %v1462_v18 }
 0x929   :  { %v1722_v2 = vpop.eup %1721 }
 0x92a   :  { %v1298_v3 = vsel %vm141_vm2, %v1722_v2, 0.0  ;;  %v1470_v21 = vpop.permute.xlu1 %1469 }
 0x92b   :  { %1299 = vadd.xlane.f32.xlu0 %v1298_v3  ;;  %v1485_v26 = vsel %vm1483_vm4, %v1482_v25, %v1470_v21 }
 0x941   :  { %1381 = vrot.lane.b32.xlu0 %v1887_v13, %s1819_s20 }
 0x945   :  { %1467 = vrot.lane.b32.xlu0 %v1047_v49, %s1820_s21 }
 0x9b4   :  { %v1297_v4 = vpop.xlane.xlu0 %1296 }
 0x9b5   :  { %1723 = vrcp.f32 %v1297_v4 }
 0x9b8   :  { %v1300_v5 = vpop.xlane.xlu0 %1299 }
 0x9b9   :  { %1725 = vrcp.f32 %v1300_v5 }
 0x9bc   :  { %v1382_v6 = vpop.permute.xlu0 %1381 }
 0x9bd   :  { %1663 = vmatpush3.msra.mxu1 %v1382_v6 }
 0x9bf   :  { %v1724_v7 = vpop.eup %1723 }
 0x9c0   :  { %v1303_v9 = vmul.f32 %v1724_v7, %v1720_v1  ;;  %v1468_v19 = vpop.permute.xlu0 %1467 }
 0x9c1   :  { %v1484_v22 = vsel %vm1483_vm4, %v1481_v20, %v1468_v19 }
 0x9c2   :  { %1660 = vmatmul.mubr.msk.f32.vlgmr.msra.gmra.mrb[14].mxu0 %vm141_vm2, %v1303_v9 }
 0x9c3   :  { %v1726_v10 = vpop.eup %1725 }
 0x9c4   :  { %v1304_v11 = vmul.f32 %v1726_v10, %v1722_v2 }
 0x9c6   :  { %1665 = vmatmul.mubr.msk.f32.vlgmr.msra.gmra.mrb[16].mxu1 %vm141_vm2, %v1304_v11 }
 0xa95   :  { %v1377_v14 = vpop.f32.mrb[14].mxu0 }
 0xa96   :  { %1475 = vrot.lane.b32.xlu0 %v1377_v14, %s1821_s24  ;;  %v1661_v15 = vpop.f32.mrb[15].mxu0 }
 0xa99   :  { %v1453_v13 = vpop.f32.mrb[16].mxu1 }
 0xa9a   :  { %1477 = vrot.lane.b32.xlu1 %v1453_v13, %s1821_s24  ;;  %v1666_v16 = vpop.f32.mrb[17].mxu1 }
 0xb08   :  { %v1476_v23 = vpop.permute.xlu0 %1475 }
 0xb09   :  { %v1487_v24 = vsel %vm1486_vm3, %v1484_v22, %v1476_v23 }
 0xb0a   :  { %1727 = vtanh.f32 %v1487_v24 }
 0xb0c   :  { %v1478_v27 = vpop.permute.xlu1 %1477 }
 0xb0d   :  { %v1488_v28 = vsel %vm1486_vm3, %v1485_v26, %v1478_v27 }
 0xb0e   :  { %1729 = vtanh.f32 %v1488_v28 }
 0xb14   :  { %v1728_v29 = vpop.eup %1727 }
 0xb15   :  { %1491 = vst.msk [vmem:[#allocation7] sm:$0xff] %vm56_vm0, %v1728_v29 }
 0xb18   :  { %v1730_v44 = vpop.eup %1729 }
 0xb19   :  { %1492 = vst.msk [vmem:[#allocation7 + $0x8] sm:$0xff] %vm56_vm0, %v1730_v44 }
 0xb1a   :  { %1786 = shalt.err (!%p1783_p6)
}
 0xb1b   :  { %s1787_s30 = scalar_lea.hbm %s2030_s3, 256 }
 0xb1c   :  { %p1788_p7 = scmp.ne.s32.totalorder %s2030_s3, %s1787_s30  ;;  %p1791_p8 = scmp.lt.u32.totalorder %s1787_s30, %s2030_s3 }
 0xb1e   :  { %p1793_p9 = pnand %p1791_p8, %p1788_p7 }
 0xb20   :  { %1796 = shalt.err (!%p1793_p9)
}
 0xb21   :  { %1504 = dma.vmem_to_hbm [thread:$0]  %s1499_s26, 256, %s2030_s3, [#allocation4], %s1804_s22, %s1804_s22, %s1805_s23  }
 0xb22   :  { %1801 = dma.done.wait [#allocation4], 256  }
 0xb23   :  { %1802 = vsyncadd [#allocation4], 4294967040 }
 0xb24   :  { %1508 = vsyncpa [#allocation3], 1 }
 0xb25   :  { %1509 = vsyncpa [#allocation6], 1 }
 0xb26   :  { %1510 = vsyncpa [#allocation4], 1 }

</bundles_post_ra>
